<compile_context>
chip_gen: v7x
topology: tpu7x:2x2x1
jax: 0.10.0
libtpu: 0.0.40
codegen_flags: <defaults>
</compile_context>

<pallas_src>
import math
import numpy as np
import jax
import jax.numpy as jnp
from jax import lax
from jax.experimental import pallas as pl
from jax.experimental.pallas import tpu as pltpu

# ---- problem sizes (small, consistent with the module) ----
B = 2                      # batch
T = 16                     # input time frames
F = 16                     # idim (input feature dim)
C = 32                     # odim (conv channels == d_model)
K = 3                      # conv kernel
S = 2                      # conv stride
T1 = (T - K) // S + 1      # 7   time after conv1
F1 = (F - K) // S + 1      # 7   freq after conv1
T2 = (T1 - K) // S + 1     # 3   time after conv2
F2 = (F1 - K) // S + 1     # 3   freq after conv2  == ((idim-1)//2-1)//2
D = C                      # model dim
XSCALE = math.sqrt(D)      # PositionalEncoding xscale


def conv2d_subsampling_kernel(x_ref, p1_ref, p2_ref, p3_ref, out_ref):
    # ---- unpack fused parameter slabs (hoisted out of the batch loop) ----
    v1   = p1_ref[0:K * F, :]                    # (48, F1*C) conv1 w, freq-im2col folded in
    b1   = p1_ref[K * F:K * F + 1, :]            # (1, F1*C)  conv1 bias tiled over f1
    w2   = p2_ref[0:K * K * C, :]                # (288, C)   conv2 w, rows = kt*3C+kf*C+c
    b2   = p2_ref[K * K * C:K * K * C + 1, :]    # (1, C)
    wlin = p3_ref[0:F2 * C, :]                   # (96, C)    linear w, rows = f2*C+o
    blin = p3_ref[F2 * C:F2 * C + 1, :]          # (1, C)
    pe   = p3_ref[F2 * C + 1:F2 * C + 1 + T2, :] # (T2, C)    positional encoding rows

    # ---- exact 0/1 stride-2 row-selection matrices, built from iota ----
    r1 = lax.broadcasted_iota(jnp.int32, (T1, T), 0)
    c1 = lax.broadcasted_iota(jnp.int32, (T1, T), 1)
    R1 = [jnp.where(c1 == S * r1 + kt, 1.0, 0.0).astype(jnp.float32) for kt in range(K)]
    r2 = lax.broadcasted_iota(jnp.int32, (T2, T1), 0)
    c2 = lax.broadcasted_iota(jnp.int32, (T2, T1), 1)
    R2 = jnp.concatenate(
        [jnp.where(c2 == S * r2 + kt, 1.0, 0.0).astype(jnp.float32) for kt in range(K)],
        axis=0)                                   # (K*T2, T1), rows = kt*T2 + t2

    for b in range(B):                            # B=2, tiny static loop
        x = x_ref[b]                              # (T, F)

        # ---- conv1 (3x3, stride 2, valid) + ReLU ----
        # acat[t1, kt*F + f] = x[2*t1 + kt, f]
        acat = jnp.concatenate(
            [jnp.dot(R1[kt], x, preferred_element_type=jnp.float32) for kt in range(K)],
            axis=1)                               # (T1, K*F)
        # h1[t1, f1*C + c] = relu(conv1)[c, t1, f1]
        h1 = jnp.maximum(jnp.dot(acat, v1, preferred_element_type=jnp.float32) + b1, 0.0)

        # ---- conv2 (3x3, stride 2, valid) + ReLU ----
        # sel[kt*T2 + t2, :] = h1[2*t2 + kt, :]
        sel = jnp.dot(R2, h1, preferred_element_type=jnp.float32)     # (K*T2, F1*C)
        zs = []
        for f2 in range(F2):
            # bcat[t2, kt*3C + kf*C + c] = relu(conv1)[c, 2*t2+kt, 2*f2+kf]
            bcat = jnp.concatenate(
                [sel[kt * T2:(kt + 1) * T2, (S * f2) * C:(S * f2 + K) * C]
                 for kt in range(K)],
                axis=1)                           # (T2, K*K*C)
            zs.append(jnp.maximum(
                jnp.dot(bcat, w2, preferred_element_type=jnp.float32) + b2, 0.0))
        # zcat[t2, f2*C + o] = relu(conv2)[o, t2, f2]
        zcat = jnp.concatenate(zs, axis=1)        # (T2, F2*C)

        # ---- Linear + PositionalEncoding (dropout p=0 -> identity) ----
        y = jnp.dot(zcat, wlin, preferred_element_type=jnp.float32) + blin   # (T2, C)
        out_ref[b] = y * XSCALE + pe


def conv2d_subsampling(x, x_mask, packed_params):
    """x: (B, T, F) f32, x_mask: (B, 1, T) or None.  Returns (y (B,T2,C), mask')."""
    p1, p2, p3 = packed_params
    y = pl.pallas_call(
        conv2d_subsampling_kernel,
        out_shape=jax.ShapeDtypeStruct((B, T2, C), jnp.float32),
        grid=(1,),
        in_specs=[
            pl.BlockSpec((B, T, F), lambda i: (0, 0, 0)),
            pl.BlockSpec(p1.shape, lambda i: (0, 0)),
            pl.BlockSpec(p2.shape, lambda i: (0, 0)),
            pl.BlockSpec(p3.shape, lambda i: (0, 0)),
        ],
        out_specs=pl.BlockSpec((B, T2, C), lambda i: (0, 0, 0)),
        compiler_params=pltpu.CompilerParams(dimension_semantics=("arbitrary",)),
    )(x, p1, p2, p3)
    if x_mask is None:
        return y, None
    # pure strided slicing (no compute): done in the wrapper
    return y, x_mask[:, :, :-2:2][:, :, :-2:2]


# ---------------- parameter construction & packing (deterministic) ----------------
def make_params(key):
    ks = jax.random.split(key, 6)
    init = lambda k, shp: (0.1 * jax.random.normal(k, shp)).astype(jnp.float32)
    W1, b1 = init(ks[0], (C, 1, K, K)), init(ks[1], (C,))        # conv1 (torch layout)
    W2, b2 = init(ks[2], (C, C, K, K)), init(ks[3], (C,))        # conv2
    Wl, bl = init(ks[4], (C, C * F2)), init(ks[5], (C,))         # linear (out, in)
    torch_params = dict(W1=W1, b1=b1, W2=W2, b2=b2, Wl=Wl, bl=bl)

    # positional encoding table (exact PyTorch formula), rows 0..T2-1
    pe = np.zeros((T2, D), np.float32)
    pos = np.arange(T2, dtype=np.float32)[:, None]
    div = np.exp(np.arange(0, D, 2, dtype=np.float32) * -(math.log(10000.0) / D))
    pe[:, 0::2] = np.sin(pos * div)
    pe[:, 1::2] = np.cos(pos * div)

    # conv1 weights scattered into (K*F, F1*C): freq-side im2col folded into the weights
    W1n = np.asarray(W1)
    v1 = np.zeros((K * F, F1 * C), np.float32)
    for kt in range(K):
        for f1 in range(F1):
            for kf in range(K):
                v1[kt * F + S * f1 + kf, f1 * C:(f1 + 1) * C] = W1n[:, 0, kt, kf]
    b1row = np.tile(np.asarray(b1), F1)[None, :]                              # (1, F1*C)

    w2cat = np.asarray(W2).transpose(2, 3, 1, 0).reshape(K * K * C, C)        # (288, C)
    b2row = np.asarray(b2)[None, :]
    wlincat = np.asarray(Wl).reshape(C, C, F2).transpose(2, 1, 0).reshape(F2 * C, C)
    blrow = np.asarray(bl)[None, :]

    p1 = jnp.asarray(np.concatenate([v1, b1row], axis=0))                     # (49, 224)
    p2 = jnp.asarray(np.concatenate([w2cat, b2row], axis=0))                  # (289, 32)
    p3 = jnp.asarray(np.concatenate([wlincat, blrow, pe], axis=0))            # (100, 32)
    return torch_params, (p1, p2, p3), jnp.asarray(pe)


# ---------------- pure-JAX reference (mirrors the PyTorch forward) ----------------
def reference(x, x_mask, p, pe):
    dn = ('NCHW', 'OIHW', 'NCHW')
    h = lax.conv_general_dilated(x[:, None, :, :], p['W1'], (S, S), 'VALID',
                                 dimension_numbers=dn) + p['b1'][None, :, None, None]
    h = jnp.maximum(h, 0.0)
    h = lax.conv_general_dilated(h, p['W2'], (S, S), 'VALID',
                                 dimension_numbers=dn) + p['b2'][None, :, None, None]
    h = jnp.maximum(h, 0.0)
    b_, c_, t_, f_ = h.shape
    z = h.transpose(0, 2, 1, 3).reshape(b_, t_, c_ * f_)
    y = z @ p['Wl'].T + p['bl']
    y = y * XSCALE + pe[None, :t_, :]
    return y, x_mask[:, :, :-2:2][:, :, :-2:2]


if __name__ == "__main__":
    key = jax.random.PRNGKey(0)
    kx, kp = jax.random.split(key)
    x = jax.random.normal(kx, (B, T, F), dtype=jnp.float32)
    lengths = jnp.array([T, T - 4])
    x_mask = (jnp.arange(T)[None, None, :] < lengths[:, None, None]).astype(jnp.float32)

    torch_params, packed_params, pe = make_params(kp)

    y, m = conv2d_subsampling(x, x_mask, packed_params)
    y = jax.block_until_ready(y)

    y_ref, m_ref = reference(x, x_mask, torch_params, pe)
    err = float(jnp.max(jnp.abs(y - y_ref)))
    assert err < 1e-3, f"output mismatch vs reference: {err}"
    assert m.shape == (B, 1, T2), f"bad mask shape: {m.shape}"
    assert bool(jnp.all(m == m_ref)), "mask mismatch"
    print("KERNEL_OK")
</pallas_src>

<mosaic_0001>
module attributes {stable_mosaic.version = 11 : i64} {
  func.func @conv2d_subsampling_kernel(%arg0: i32, %arg1: memref<2x16x16xf32, #tpu.memory_space<vmem>>, %arg2: memref<49x224xf32, #tpu.memory_space<vmem>>, %arg3: memref<289x32xf32, #tpu.memory_space<vmem>>, %arg4: memref<100x32xf32, #tpu.memory_space<vmem>>, %arg5: memref<2x3x32xf32, #tpu.memory_space<vmem>>) attributes {dimension_semantics = [#tpu.dimension_semantics<arbitrary>], iteration_bounds = array<i64: 1>, scalar_prefetch = 0 : i64, scratch_operands = 0 : i64, tpu.core_type = #tpu.core_type<tc>, window_params = [{pipeline_mode = #tpu.pipeline_mode<synchronous>, transform_indices = @transform_0, window_bounds = array<i64: 2, 16, 16>}, {pipeline_mode = #tpu.pipeline_mode<synchronous>, transform_indices = @transform_1, window_bounds = array<i64: 49, 224>}, {pipeline_mode = #tpu.pipeline_mode<synchronous>, transform_indices = @transform_2, window_bounds = array<i64: 289, 32>}, {pipeline_mode = #tpu.pipeline_mode<synchronous>, transform_indices = @transform_3, window_bounds = array<i64: 100, 32>}, {pipeline_mode = #tpu.pipeline_mode<synchronous>, transform_indices = @transform_4, window_bounds = array<i64: 2, 3, 32>}]} {
    %c0 = arith.constant 0 : index
    %c0_0 = arith.constant 0 : index
    %0 = vector.load %arg2[%c0, %c0_0] : memref<49x224xf32, #tpu.memory_space<vmem>>, vector<48x224xf32>
    %c48 = arith.constant 48 : index
    %c0_1 = arith.constant 0 : index
    %1 = vector.load %arg2[%c48, %c0_1] : memref<49x224xf32, #tpu.memory_space<vmem>>, vector<1x224xf32>
    %c0_2 = arith.constant 0 : index
    %c0_3 = arith.constant 0 : index
    %2 = vector.load %arg3[%c0_2, %c0_3] : memref<289x32xf32, #tpu.memory_space<vmem>>, vector<288x32xf32>
    %c288 = arith.constant 288 : index
    %c0_4 = arith.constant 0 : index
    %3 = vector.load %arg3[%c288, %c0_4] : memref<289x32xf32, #tpu.memory_space<vmem>>, vector<1x32xf32>
    %c0_5 = arith.constant 0 : index
    %c0_6 = arith.constant 0 : index
    %4 = vector.load %arg4[%c0_5, %c0_6] : memref<100x32xf32, #tpu.memory_space<vmem>>, vector<96x32xf32>
    %c96 = arith.constant 96 : index
    %c0_7 = arith.constant 0 : index
    %5 = vector.load %arg4[%c96, %c0_7] : memref<100x32xf32, #tpu.memory_space<vmem>>, vector<1x32xf32>
    %c97 = arith.constant 97 : index
    %c0_8 = arith.constant 0 : index
    %6 = vector.load %arg4[%c97, %c0_8] : memref<100x32xf32, #tpu.memory_space<vmem>>, vector<3x32xf32>
    %7 = tpu.iota {dimensions = array<i32: 0>} : vector<7x16xi32>
    %8 = tpu.iota {dimensions = array<i32: 1>} : vector<7x16xi32>
    %c2_i32 = arith.constant 2 : i32
    %9 = vector.broadcast %c2_i32 : i32 to vector<7x16xi32>
    %10 = arith.muli %9, %7 : vector<7x16xi32>
    %c0_i32 = arith.constant 0 : i32
    %11 = vector.broadcast %c0_i32 : i32 to vector<7x16xi32>
    %12 = arith.addi %10, %11 : vector<7x16xi32>
    %13 = arith.cmpi eq, %8, %12 : vector<7x16xi32>
    %cst = arith.constant 1.000000e+00 : f32
    %cst_9 = arith.constant 0.000000e+00 : f32
    %14 = vector.broadcast %cst : f32 to vector<7x16xf32>
    %15 = vector.broadcast %cst_9 : f32 to vector<7x16xf32>
    %16 = arith.select %13, %14, %15 : vector<7x16xi1>, vector<7x16xf32>
    %c2_i32_10 = arith.constant 2 : i32
    %17 = vector.broadcast %c2_i32_10 : i32 to vector<7x16xi32>
    %18 = arith.muli %17, %7 : vector<7x16xi32>
    %c1_i32 = arith.constant 1 : i32
    %19 = vector.broadcast %c1_i32 : i32 to vector<7x16xi32>
    %20 = arith.addi %18, %19 : vector<7x16xi32>
    %21 = arith.cmpi eq, %8, %20 : vector<7x16xi32>
    %cst_11 = arith.constant 1.000000e+00 : f32
    %cst_12 = arith.constant 0.000000e+00 : f32
    %22 = vector.broadcast %cst_11 : f32 to vector<7x16xf32>
    %23 = vector.broadcast %cst_12 : f32 to vector<7x16xf32>
    %24 = arith.select %21, %22, %23 : vector<7x16xi1>, vector<7x16xf32>
    %c2_i32_13 = arith.constant 2 : i32
    %25 = vector.broadcast %c2_i32_13 : i32 to vector<7x16xi32>
    %26 = arith.muli %25, %7 : vector<7x16xi32>
    %c2_i32_14 = arith.constant 2 : i32
    %27 = vector.broadcast %c2_i32_14 : i32 to vector<7x16xi32>
    %28 = arith.addi %26, %27 : vector<7x16xi32>
    %29 = arith.cmpi eq, %8, %28 : vector<7x16xi32>
    %cst_15 = arith.constant 1.000000e+00 : f32
    %cst_16 = arith.constant 0.000000e+00 : f32
    %30 = vector.broadcast %cst_15 : f32 to vector<7x16xf32>
    %31 = vector.broadcast %cst_16 : f32 to vector<7x16xf32>
    %32 = arith.select %29, %30, %31 : vector<7x16xi1>, vector<7x16xf32>
    %33 = tpu.iota {dimensions = array<i32: 0>} : vector<3x7xi32>
    %34 = tpu.iota {dimensions = array<i32: 1>} : vector<3x7xi32>
    %c2_i32_17 = arith.constant 2 : i32
    %35 = vector.broadcast %c2_i32_17 : i32 to vector<3x7xi32>
    %36 = arith.muli %35, %33 : vector<3x7xi32>
    %c0_i32_18 = arith.constant 0 : i32
    %37 = vector.broadcast %c0_i32_18 : i32 to vector<3x7xi32>
    %38 = arith.addi %36, %37 : vector<3x7xi32>
    %39 = arith.cmpi eq, %34, %38 : vector<3x7xi32>
    %cst_19 = arith.constant 1.000000e+00 : f32
    %cst_20 = arith.constant 0.000000e+00 : f32
    %40 = vector.broadcast %cst_19 : f32 to vector<3x7xf32>
    %41 = vector.broadcast %cst_20 : f32 to vector<3x7xf32>
    %42 = arith.select %39, %40, %41 : vector<3x7xi1>, vector<3x7xf32>
    %c2_i32_21 = arith.constant 2 : i32
    %43 = vector.broadcast %c2_i32_21 : i32 to vector<3x7xi32>
    %44 = arith.muli %43, %33 : vector<3x7xi32>
    %c1_i32_22 = arith.constant 1 : i32
    %45 = vector.broadcast %c1_i32_22 : i32 to vector<3x7xi32>
    %46 = arith.addi %44, %45 : vector<3x7xi32>
    %47 = arith.cmpi eq, %34, %46 : vector<3x7xi32>
    %cst_23 = arith.constant 1.000000e+00 : f32
    %cst_24 = arith.constant 0.000000e+00 : f32
    %48 = vector.broadcast %cst_23 : f32 to vector<3x7xf32>
    %49 = vector.broadcast %cst_24 : f32 to vector<3x7xf32>
    %50 = arith.select %47, %48, %49 : vector<3x7xi1>, vector<3x7xf32>
    %c2_i32_25 = arith.constant 2 : i32
    %51 = vector.broadcast %c2_i32_25 : i32 to vector<3x7xi32>
    %52 = arith.muli %51, %33 : vector<3x7xi32>
    %c2_i32_26 = arith.constant 2 : i32
    %53 = vector.broadcast %c2_i32_26 : i32 to vector<3x7xi32>
    %54 = arith.addi %52, %53 : vector<3x7xi32>
    %55 = arith.cmpi eq, %34, %54 : vector<3x7xi32>
    %cst_27 = arith.constant 1.000000e+00 : f32
    %cst_28 = arith.constant 0.000000e+00 : f32
    %56 = vector.broadcast %cst_27 : f32 to vector<3x7xf32>
    %57 = vector.broadcast %cst_28 : f32 to vector<3x7xf32>
    %58 = arith.select %55, %56, %57 : vector<3x7xi1>, vector<3x7xf32>
    %59 = tpu.concatenate %42, %50, %58 in 0 : vector<3x7xf32>, vector<3x7xf32>, vector<3x7xf32> -> vector<9x7xf32>
    %c0_29 = arith.constant 0 : index
    %c0_30 = arith.constant 0 : index
    %c0_31 = arith.constant 0 : index
    %60 = vector.load %arg1[%c0_29, %c0_30, %c0_31] : memref<2x16x16xf32, #tpu.memory_space<vmem>>, vector<1x16x16xf32>
    %61 = vector.shape_cast %60 : vector<1x16x16xf32> to vector<16x16xf32>
    %cst_32 = arith.constant dense<0.000000e+00> : vector<7x16xf32>
    %62 = tpu.matmul %16, %61, %cst_32 {dimension_numbers = #tpu.dot_dimension_numbers<[1], [0], [0], [1], [0, 0, 1, 1], [], []>} : vector<7x16xf32>, vector<16x16xf32>, vector<7x16xf32> -> vector<7x16xf32>
    %cst_33 = arith.constant dense<0.000000e+00> : vector<7x16xf32>
    %63 = tpu.matmul %24, %61, %cst_33 {dimension_numbers = #tpu.dot_dimension_numbers<[1], [0], [0], [1], [0, 0, 1, 1], [], []>} : vector<7x16xf32>, vector<16x16xf32>, vector<7x16xf32> -> vector<7x16xf32>
    %cst_34 = arith.constant dense<0.000000e+00> : vector<7x16xf32>
    %64 = tpu.matmul %32, %61, %cst_34 {dimension_numbers = #tpu.dot_dimension_numbers<[1], [0], [0], [1], [0, 0, 1, 1], [], []>} : vector<7x16xf32>, vector<16x16xf32>, vector<7x16xf32> -> vector<7x16xf32>
    %65 = tpu.concatenate %62, %63, %64 in 1 : vector<7x16xf32>, vector<7x16xf32>, vector<7x16xf32> -> vector<7x48xf32>
    %cst_35 = arith.constant dense<0.000000e+00> : vector<7x224xf32>
    %66 = tpu.matmul %65, %0, %cst_35 {dimension_numbers = #tpu.dot_dimension_numbers<[1], [0], [0], [1], [0, 0, 1, 1], [], []>} : vector<7x48xf32>, vector<48x224xf32>, vector<7x224xf32> -> vector<7x224xf32>
    %67 = vector.broadcast %1 : vector<1x224xf32> to vector<7x224xf32>
    %68 = arith.addf %66, %67 : vector<7x224xf32>
    %cst_36 = arith.constant 0.000000e+00 : f32
    %69 = vector.broadcast %cst_36 : f32 to vector<7x224xf32>
    %70 = arith.maximumf %68, %69 : vector<7x224xf32>
    %cst_37 = arith.constant dense<0.000000e+00> : vector<9x224xf32>
    %71 = tpu.matmul %59, %70, %cst_37 {dimension_numbers = #tpu.dot_dimension_numbers<[1], [0], [0], [1], [0, 0, 1, 1], [], []>} : vector<9x7xf32>, vector<7x224xf32>, vector<9x224xf32> -> vector<9x224xf32>
    %72 = vector.extract_strided_slice %71 {offsets = [0, 0], sizes = [3, 96], strides = [1, 1]} : vector<9x224xf32> to vector<3x96xf32>
    %73 = vector.extract_strided_slice %71 {offsets = [3, 0], sizes = [3, 96], strides = [1, 1]} : vector<9x224xf32> to vector<3x96xf32>
    %74 = vector.extract_strided_slice %71 {offsets = [6, 0], sizes = [3, 96], strides = [1, 1]} : vector<9x224xf32> to vector<3x96xf32>
    %75 = tpu.concatenate %72, %73, %74 in 1 : vector<3x96xf32>, vector<3x96xf32>, vector<3x96xf32> -> vector<3x288xf32>
    %cst_38 = arith.constant dense<0.000000e+00> : vector<3x32xf32>
    %76 = tpu.matmul %75, %2, %cst_38 {dimension_numbers = #tpu.dot_dimension_numbers<[1], [0], [0], [1], [0, 0, 1, 1], [], []>} : vector<3x288xf32>, vector<288x32xf32>, vector<3x32xf32> -> vector<3x32xf32>
    %77 = vector.broadcast %3 : vector<1x32xf32> to vector<3x32xf32>
    %78 = arith.addf %76, %77 : vector<3x32xf32>
    %cst_39 = arith.constant 0.000000e+00 : f32
    %79 = vector.broadcast %cst_39 : f32 to vector<3x32xf32>
    %80 = arith.maximumf %78, %79 : vector<3x32xf32>
    %81 = vector.extract_strided_slice %71 {offsets = [0, 64], sizes = [3, 96], strides = [1, 1]} : vector<9x224xf32> to vector<3x96xf32>
    %82 = vector.extract_strided_slice %71 {offsets = [3, 64], sizes = [3, 96], strides = [1, 1]} : vector<9x224xf32> to vector<3x96xf32>
    %83 = vector.extract_strided_slice %71 {offsets = [6, 64], sizes = [3, 96], strides = [1, 1]} : vector<9x224xf32> to vector<3x96xf32>
    %84 = tpu.concatenate %81, %82, %83 in 1 : vector<3x96xf32>, vector<3x96xf32>, vector<3x96xf32> -> vector<3x288xf32>
    %cst_40 = arith.constant dense<0.000000e+00> : vector<3x32xf32>
    %85 = tpu.matmul %84, %2, %cst_40 {dimension_numbers = #tpu.dot_dimension_numbers<[1], [0], [0], [1], [0, 0, 1, 1], [], []>} : vector<3x288xf32>, vector<288x32xf32>, vector<3x32xf32> -> vector<3x32xf32>
    %86 = vector.broadcast %3 : vector<1x32xf32> to vector<3x32xf32>
    %87 = arith.addf %85, %86 : vector<3x32xf32>
    %cst_41 = arith.constant 0.000000e+00 : f32
    %88 = vector.broadcast %cst_41 : f32 to vector<3x32xf32>
    %89 = arith.maximumf %87, %88 : vector<3x32xf32>
    %90 = vector.extract_strided_slice %71 {offsets = [0, 128], sizes = [3, 96], strides = [1, 1]} : vector<9x224xf32> to vector<3x96xf32>
    %91 = vector.extract_strided_slice %71 {offsets = [3, 128], sizes = [3, 96], strides = [1, 1]} : vector<9x224xf32> to vector<3x96xf32>
    %92 = vector.extract_strided_slice %71 {offsets = [6, 128], sizes = [3, 96], strides = [1, 1]} : vector<9x224xf32> to vector<3x96xf32>
    %93 = tpu.concatenate %90, %91, %92 in 1 : vector<3x96xf32>, vector<3x96xf32>, vector<3x96xf32> -> vector<3x288xf32>
    %cst_42 = arith.constant dense<0.000000e+00> : vector<3x32xf32>
    %94 = tpu.matmul %93, %2, %cst_42 {dimension_numbers = #tpu.dot_dimension_numbers<[1], [0], [0], [1], [0, 0, 1, 1], [], []>} : vector<3x288xf32>, vector<288x32xf32>, vector<3x32xf32> -> vector<3x32xf32>
    %95 = vector.broadcast %3 : vector<1x32xf32> to vector<3x32xf32>
    %96 = arith.addf %94, %95 : vector<3x32xf32>
    %cst_43 = arith.constant 0.000000e+00 : f32
    %97 = vector.broadcast %cst_43 : f32 to vector<3x32xf32>
    %98 = arith.maximumf %96, %97 : vector<3x32xf32>
    %99 = tpu.concatenate %80, %89, %98 in 1 : vector<3x32xf32>, vector<3x32xf32>, vector<3x32xf32> -> vector<3x96xf32>
    %cst_44 = arith.constant dense<0.000000e+00> : vector<3x32xf32>
    %100 = tpu.matmul %99, %4, %cst_44 {dimension_numbers = #tpu.dot_dimension_numbers<[1], [0], [0], [1], [0, 0, 1, 1], [], []>} : vector<3x96xf32>, vector<96x32xf32>, vector<3x32xf32> -> vector<3x32xf32>
    %101 = vector.broadcast %5 : vector<1x32xf32> to vector<3x32xf32>
    %102 = arith.addf %100, %101 : vector<3x32xf32>
    %cst_45 = arith.constant 5.65685415 : f32
    %103 = vector.broadcast %cst_45 : f32 to vector<3x32xf32>
    %104 = arith.mulf %102, %103 : vector<3x32xf32>
    %105 = arith.addf %104, %6 : vector<3x32xf32>
    %c0_46 = arith.constant 0 : index
    %c0_47 = arith.constant 0 : index
    %c0_48 = arith.constant 0 : index
    %106 = vector.load %arg5[%c0_46, %c0_47, %c0_48] : memref<2x3x32xf32, #tpu.memory_space<vmem>>, vector<1x3x32xf32>
    %107 = vector.shape_cast %106 : vector<1x3x32xf32> to vector<3x32xf32>
    %108 = vector.shape_cast %105 : vector<3x32xf32> to vector<1x3x32xf32>
    tpu.vector_store %arg5[%c0_46, %c0_47, %c0_48], %108 {strides = array<i32>} : memref<2x3x32xf32, #tpu.memory_space<vmem>>, vector<1x3x32xf32>,
    %c1 = arith.constant 1 : index
    %c0_49 = arith.constant 0 : index
    %c0_50 = arith.constant 0 : index
    %109 = vector.load %arg1[%c1, %c0_49, %c0_50] : memref<2x16x16xf32, #tpu.memory_space<vmem>>, vector<1x16x16xf32>
    %110 = vector.shape_cast %109 : vector<1x16x16xf32> to vector<16x16xf32>
    %cst_51 = arith.constant dense<0.000000e+00> : vector<7x16xf32>
    %111 = tpu.matmul %16, %110, %cst_51 {dimension_numbers = #tpu.dot_dimension_numbers<[1], [0], [0], [1], [0, 0, 1, 1], [], []>} : vector<7x16xf32>, vector<16x16xf32>, vector<7x16xf32> -> vector<7x16xf32>
    %cst_52 = arith.constant dense<0.000000e+00> : vector<7x16xf32>
    %112 = tpu.matmul %24, %110, %cst_52 {dimension_numbers = #tpu.dot_dimension_numbers<[1], [0], [0], [1], [0, 0, 1, 1], [], []>} : vector<7x16xf32>, vector<16x16xf32>, vector<7x16xf32> -> vector<7x16xf32>
    %cst_53 = arith.constant dense<0.000000e+00> : vector<7x16xf32>
    %113 = tpu.matmul %32, %110, %cst_53 {dimension_numbers = #tpu.dot_dimension_numbers<[1], [0], [0], [1], [0, 0, 1, 1], [], []>} : vector<7x16xf32>, vector<16x16xf32>, vector<7x16xf32> -> vector<7x16xf32>
    %114 = tpu.concatenate %111, %112, %113 in 1 : vector<7x16xf32>, vector<7x16xf32>, vector<7x16xf32> -> vector<7x48xf32>
    %cst_54 = arith.constant dense<0.000000e+00> : vector<7x224xf32>
    %115 = tpu.matmul %114, %0, %cst_54 {dimension_numbers = #tpu.dot_dimension_numbers<[1], [0], [0], [1], [0, 0, 1, 1], [], []>} : vector<7x48xf32>, vector<48x224xf32>, vector<7x224xf32> -> vector<7x224xf32>
    %116 = vector.broadcast %1 : vector<1x224xf32> to vector<7x224xf32>
    %117 = arith.addf %115, %116 : vector<7x224xf32>
    %cst_55 = arith.constant 0.000000e+00 : f32
    %118 = vector.broadcast %cst_55 : f32 to vector<7x224xf32>
    %119 = arith.maximumf %117, %118 : vector<7x224xf32>
    %cst_56 = arith.constant dense<0.000000e+00> : vector<9x224xf32>
    %120 = tpu.matmul %59, %119, %cst_56 {dimension_numbers = #tpu.dot_dimension_numbers<[1], [0], [0], [1], [0, 0, 1, 1], [], []>} : vector<9x7xf32>, vector<7x224xf32>, vector<9x224xf32> -> vector<9x224xf32>
    %121 = vector.extract_strided_slice %120 {offsets = [0, 0], sizes = [3, 96], strides = [1, 1]} : vector<9x224xf32> to vector<3x96xf32>
    %122 = vector.extract_strided_slice %120 {offsets = [3, 0], sizes = [3, 96], strides = [1, 1]} : vector<9x224xf32> to vector<3x96xf32>
    %123 = vector.extract_strided_slice %120 {offsets = [6, 0], sizes = [3, 96], strides = [1, 1]} : vector<9x224xf32> to vector<3x96xf32>
    %124 = tpu.concatenate %121, %122, %123 in 1 : vector<3x96xf32>, vector<3x96xf32>, vector<3x96xf32> -> vector<3x288xf32>
    %cst_57 = arith.constant dense<0.000000e+00> : vector<3x32xf32>
    %125 = tpu.matmul %124, %2, %cst_57 {dimension_numbers = #tpu.dot_dimension_numbers<[1], [0], [0], [1], [0, 0, 1, 1], [], []>} : vector<3x288xf32>, vector<288x32xf32>, vector<3x32xf32> -> vector<3x32xf32>
    %126 = vector.broadcast %3 : vector<1x32xf32> to vector<3x32xf32>
    %127 = arith.addf %125, %126 : vector<3x32xf32>
    %cst_58 = arith.constant 0.000000e+00 : f32
    %128 = vector.broadcast %cst_58 : f32 to vector<3x32xf32>
    %129 = arith.maximumf %127, %128 : vector<3x32xf32>
    %130 = vector.extract_strided_slice %120 {offsets = [0, 64], sizes = [3, 96], strides = [1, 1]} : vector<9x224xf32> to vector<3x96xf32>
    %131 = vector.extract_strided_slice %120 {offsets = [3, 64], sizes = [3, 96], strides = [1, 1]} : vector<9x224xf32> to vector<3x96xf32>
    %132 = vector.extract_strided_slice %120 {offsets = [6, 64], sizes = [3, 96], strides = [1, 1]} : vector<9x224xf32> to vector<3x96xf32>
    %133 = tpu.concatenate %130, %131, %132 in 1 : vector<3x96xf32>, vector<3x96xf32>, vector<3x96xf32> -> vector<3x288xf32>
    %cst_59 = arith.constant dense<0.000000e+00> : vector<3x32xf32>
    %134 = tpu.matmul %133, %2, %cst_59 {dimension_numbers = #tpu.dot_dimension_numbers<[1], [0], [0], [1], [0, 0, 1, 1], [], []>} : vector<3x288xf32>, vector<288x32xf32>, vector<3x32xf32> -> vector<3x32xf32>
    %135 = vector.broadcast %3 : vector<1x32xf32> to vector<3x32xf32>
    %136 = arith.addf %134, %135 : vector<3x32xf32>
    %cst_60 = arith.constant 0.000000e+00 : f32
    %137 = vector.broadcast %cst_60 : f32 to vector<3x32xf32>
    %138 = arith.maximumf %136, %137 : vector<3x32xf32>
    %139 = vector.extract_strided_slice %120 {offsets = [0, 128], sizes = [3, 96], strides = [1, 1]} : vector<9x224xf32> to vector<3x96xf32>
    %140 = vector.extract_strided_slice %120 {offsets = [3, 128], sizes = [3, 96], strides = [1, 1]} : vector<9x224xf32> to vector<3x96xf32>
    %141 = vector.extract_strided_slice %120 {offsets = [6, 128], sizes = [3, 96], strides = [1, 1]} : vector<9x224xf32> to vector<3x96xf32>
    %142 = tpu.concatenate %139, %140, %141 in 1 : vector<3x96xf32>, vector<3x96xf32>, vector<3x96xf32> -> vector<3x288xf32>
    %cst_61 = arith.constant dense<0.000000e+00> : vector<3x32xf32>
    %143 = tpu.matmul %142, %2, %cst_61 {dimension_numbers = #tpu.dot_dimension_numbers<[1], [0], [0], [1], [0, 0, 1, 1], [], []>} : vector<3x288xf32>, vector<288x32xf32>, vector<3x32xf32> -> vector<3x32xf32>
    %144 = vector.broadcast %3 : vector<1x32xf32> to vector<3x32xf32>
    %145 = arith.addf %143, %144 : vector<3x32xf32>
    %cst_62 = arith.constant 0.000000e+00 : f32
    %146 = vector.broadcast %cst_62 : f32 to vector<3x32xf32>
    %147 = arith.maximumf %145, %146 : vector<3x32xf32>
    %148 = tpu.concatenate %129, %138, %147 in 1 : vector<3x32xf32>, vector<3x32xf32>, vector<3x32xf32> -> vector<3x96xf32>
    %cst_63 = arith.constant dense<0.000000e+00> : vector<3x32xf32>
    %149 = tpu.matmul %148, %4, %cst_63 {dimension_numbers = #tpu.dot_dimension_numbers<[1], [0], [0], [1], [0, 0, 1, 1], [], []>} : vector<3x96xf32>, vector<96x32xf32>, vector<3x32xf32> -> vector<3x32xf32>
    %150 = vector.broadcast %5 : vector<1x32xf32> to vector<3x32xf32>
    %151 = arith.addf %149, %150 : vector<3x32xf32>
    %cst_64 = arith.constant 5.65685415 : f32
    %152 = vector.broadcast %cst_64 : f32 to vector<3x32xf32>
    %153 = arith.mulf %151, %152 : vector<3x32xf32>
    %154 = arith.addf %153, %6 : vector<3x32xf32>
    %c1_65 = arith.constant 1 : index
    %c0_66 = arith.constant 0 : index
    %c0_67 = arith.constant 0 : index
    %155 = vector.load %arg5[%c1_65, %c0_66, %c0_67] : memref<2x3x32xf32, #tpu.memory_space<vmem>>, vector<1x3x32xf32>
    %156 = vector.shape_cast %155 : vector<1x3x32xf32> to vector<3x32xf32>
    %157 = vector.shape_cast %154 : vector<3x32xf32> to vector<1x3x32xf32>
    tpu.vector_store %arg5[%c1_65, %c0_66, %c0_67], %157 {strides = array<i32>} : memref<2x3x32xf32, #tpu.memory_space<vmem>>, vector<1x3x32xf32>,
    return
  }
  func.func @transform_0(%arg0: i32) -> (i32, i32, i32) {
    %c0_i32 = arith.constant 0 : i32
    %c0_i32_0 = arith.constant 0 : i32
    %c0_i32_1 = arith.constant 0 : i32
    %c0_i32_2 = arith.constant 0 : i32
    return %c0_i32, %c0_i32_0, %c0_i32_1 : i32, i32, i32
  }
  func.func @transform_1(%arg0: i32) -> (i32, i32) {
    %c0_i32 = arith.constant 0 : i32
    %c0_i32_0 = arith.constant 0 : i32
    %c0_i32_1 = arith.constant 0 : i32
    return %c0_i32, %c0_i32_0 : i32, i32
  }
  func.func @transform_2(%arg0: i32) -> (i32, i32) {
    %c0_i32 = arith.constant 0 : i32
    %c0_i32_0 = arith.constant 0 : i32
    %c0_i32_1 = arith.constant 0 : i32
    return %c0_i32, %c0_i32_0 : i32, i32
  }
  func.func @transform_3(%arg0: i32) -> (i32, i32) {
    %c0_i32 = arith.constant 0 : i32
    %c0_i32_0 = arith.constant 0 : i32
    %c0_i32_1 = arith.constant 0 : i32
    return %c0_i32, %c0_i32_0 : i32, i32
  }
  func.func @transform_4(%arg0: i32) -> (i32, i32, i32) {
    %c0_i32 = arith.constant 0 : i32
    %c0_i32_0 = arith.constant 0 : i32
    %c0_i32_1 = arith.constant 0 : i32
    %c0_i32_2 = arith.constant 0 : i32
    return %c0_i32, %c0_i32_0, %c0_i32_1 : i32, i32, i32
  }
}

</mosaic_0001>

<bundles_post_ra>
// kernel: tpu_custom_call.1
= control target key start
LH: loop header
LB: loop body
LE: loop exit
PB: predicated region body
PF: predicated region fallthrough
CT: control target
= control target key end

     0   :  { %v82_v0 = vlaneseq  ;;  %v2840_v1 = vmov 0.0|0.0   ;;  %vm2841_vm0 = vmmov 0   ;;  %v2842_v4 = vmov 0.0   ;;  %s2843_s17 = smov 16   ;;  %s2844_s18 = smov 32   ;;  %s3485_s0 = inlined_call_operand.vmem [shape: f32[2,16,16], index: 0, kind: input, shape index: {}]   ;;  %s3486_s1 = inlined_call_operand.vmem [shape: f32[49,224], index: 1, kind: input, shape index: {}]   ;;  %s3487_s2 = inlined_call_operand.vmem [shape: f32[289,32], index: 2, kind: input, shape index: {}]   ;;  %s3488_s3 = inlined_call_operand.vmem [shape: f32[100,32], index: 3, kind: input, shape index: {}]   ;;  %s3489_s4 = inlined_call_operand.vmem [shape: f32[2,3,32], index: 4, kind: output, shape index: {}]  }
   0x1   :  { %2507 = vmatprep.subr.bf16.mxu1 %v2840_v1  ;;  %v105_v2 = vld [vmem:[%s3485_s0] sm:$0xff]  ;;  %v106_v3 = vld [vmem:[%s3485_s0 + $0x8] sm:$0xff]  ;;  %2349 = vmatprep.mubr.msk.f32.mxu1 %vm2841_vm0, %v2842_v4  ;;  %vm107_vm1 = vcmask 130048   ;;  %v20_v15 = vld [vmem:[%s3486_s1 + $0x18] sm:$0xff]  ;;  %vm334_vm5 = vcmask 261120   ;;  %vm347_vm6 = vcmask 392192  }
   0x2   :  { %v2508_v5 = vpack.c.bf16 %v106_v3, %v105_v2  ;;  %v2881_v6 = vshrl.u32 %v82_v0, 7  ;;  %v85_v7 = vand.u32 127, %v82_v0  ;;  %2513 = vmatprep.subr.bf16.mxu0 %v2840_v1  ;;  %2363 = vmatprep.mubr.msk.f32.mxu0 %vm2841_vm0, %v2842_v4  ;;  %v18_v14 = vld [vmem:[%s3486_s1 + $0x8] sm:$0xff]  ;;  %v17_v16 = vld [vmem:[%s3486_s1] sm:$0xff]  ;;  %v19_v18 = vld [vmem:[%s3486_s1 + $0x10] sm:$0xff]  ;;  %vm101_vm7 = vcmask 1042432  }
   0x3   :  { %v2916_v17 = vpack.c.bf16 %v20_v15, %v18_v14  ;;  %v22_v19 = vld [vmem:[%s3486_s1 + $0x28] sm:$0xff]  ;;  %v24_v20 = vld [vmem:[%s3486_s1 + $0x38] sm:$0xff]  ;;  %v2927_v21 = vpack.c.bf16 %v19_v18, %v17_v16  ;;  %v21_v23 = vld [vmem:[%s3486_s1 + $0x20] sm:$0xff]  ;;  %vm103_vm8 = vcmask 1045504   ;;  %vm430_vm9 = vcmask 1046528   ;;  %s2845_s16 = smov 96  }
   0x4   :  { %2509 = vmatpush3.bf16.msra.mxu1 %v2508_v5  ;;  %v86_v8 = vmul.u32 2, %v2881_v6  ;;  %2515 = vmatpush3.bf16.msra.mxu0 %v2508_v5  ;;  %v2929_v22 = vpack.c.bf16 %v24_v20, %v22_v19  ;;  %v23_v24 = vld [vmem:[%s3486_s1 + $0x30] sm:$0xff]  ;;  %v26_v26 = vld [vmem:[%s3486_s1 + $0x48] sm:$0xff]  ;;  %v28_v27 = vld [vmem:[%s3486_s1 + $0x58] sm:$0xff]  ;;  %v339_v42 = vsub.s32 0, %v2881_v6  ;;  %v343_v44 = vsub.s32 1, %v2881_v6 }
   0x5   :  { %2510 = vmatprep.subr.bf16.mxu1 %v2840_v1  ;;  %v2939_v25 = vpack.c.bf16 %v23_v24, %v21_v23  ;;  %v2949_v28 = vpack.c.bf16 %v28_v27, %v26_v26  ;;  %v25_v29 = vld [vmem:[%s3486_s1 + $0x40] sm:$0xff]  ;;  %v27_v30 = vld [vmem:[%s3486_s1 + $0x50] sm:$0xff]  ;;  %vm424_vm10 = vcmask 56320   ;;  %v48_v58 = vld [vmem:[%s3487_s2 + $0x88] sm:$0xff]  ;;  %vm520_vm11 = vcmask 1041408   ;;  %s2846_s19 = smov 64  }
   0x6   :  { %vm87_vm2 = vcmp.eq.s32.totalorder %v85_v7, %v86_v8  ;;  %v89_v9 = vadd.s32 1, %v86_v8  ;;  %v92_v10 = vadd.s32 2, %v86_v8  ;;  %v2957_v31 = vpack.c.bf16 %v27_v30, %v25_v29  ;;  %v2031_v43 = vld [vmem:[%s3486_s1 + $0x60] ss:$8 sm:$0x3]  ;;  %v49_v62 = vld [vmem:[%s3487_s2 + $0x90] sm:$0xff] }
   0x7   :  { %v2889_v11 = vsel %vm87_vm2, 1.0, %v2842_v4  ;;  %v2974_v45 = vrot.slane %v2031_v43, %v339_v42  ;;  %v2977_v47 = vrot.slane %v2031_v43, %v343_v44  ;;  %v47_v57 = vld [vmem:[%s3487_s2 + $0x80] sm:$0xff]  ;;  %v32_v61 = vld [vmem:[%s3487_s2 + $0x8] sm:$0xff]  ;;  %v50_v63 = vld [vmem:[%s3487_s2 + $0x98] sm:$0xff]  ;;  %vm529_vm12 = vcmask 523264  }
   0x8   :  { %vm90_vm3 = vcmp.eq.s32.totalorder %v85_v7, %v89_v9  ;;  %2350 = vmatmul.mubr.msk.f32.vlgmr.msra.gmra.mrb[0].mxu1 %vm107_vm1, %v2889_v11  ;;  %vm93_vm4 = vcmp.eq.s32.totalorder %v85_v7, %v92_v10  ;;  %v31_v59 = vld [vmem:[%s3487_s2] sm:$0xff]  ;;  %v3004_v60 = vpack.c.bf16 %v48_v58, %v47_v57  ;;  %v3017_v2 = vpack.c.bf16 %v50_v63, %v49_v62  ;;  %v33_v3 = vld [vmem:[%s3487_s2 + $0x10] sm:$0xff]  ;;  %v52_v7 = vld [vmem:[%s3487_s2 + $0xa8] sm:$0xff] }
   0x9   :  { %v2894_v12 = vsel %vm90_vm3, 1.0, %v2842_v4  ;;  %2512 = vmatpush3.bf16.msra.mxu1 %v2508_v5  ;;  %2356 = vmatprep.mubr.msk.f32.mxu1 %vm2841_vm0, %v2842_v4  ;;  %v2899_v13 = vsel %vm93_vm4, 1.0, %v2842_v4  ;;  %v3015_v0 = vpack.c.bf16 %v32_v61, %v31_v59  ;;  %v34_v5 = vld [vmem:[%s3487_s2 + $0x18] sm:$0xff]  ;;  %v51_v6 = vld [vmem:[%s3487_s2 + $0xa0] sm:$0xff]  ;;  %v36_v14 = vld [vmem:[%s3487_s2 + $0x28] sm:$0xff]  ;;  %vm527_vm13 = vcmask 785408  }
   0xa   :  { %2364 = vmatmul.mubr.msk.f32.vlgmr.msra.gmra.mrb[0].mxu0 %vm107_vm1, %v2899_v13  ;;  %2517 = vmatprep.subr.bf16.mxu1 %v2916_v17  ;;  %v96_v46 = vrot.slane %v2894_v12, 5  ;;  %v2980_v49 = vrot.slane %v2899_v13, 2  ;;  %v3033_v8 = vpack.c.bf16 %v34_v5, %v33_v3  ;;  %v3036_v9 = vpack.c.bf16 %v52_v7, %v51_v6  ;;  %v35_v10 = vld [vmem:[%s3487_s2 + $0x20] sm:$0xff]  ;;  %v53_v15 = vld [vmem:[%s3487_s2 + $0xb0] sm:$0xff]  ;;  %v54_v16 = vld [vmem:[%s3487_s2 + $0xb8] sm:$0xff] }
   0xb   :  { %501 = vmatprep.mubr.f32.mxu0 %v2842_v4  ;;  %v3051_v18 = vpack.c.bf16 %v36_v14, %v35_v10  ;;  %v63_v19 = vld [vmem:[%s3487_s2 + $0x100] sm:$0xff]  ;;  %v64_v20 = vld [vmem:[%s3487_s2 + $0x108] sm:$0xff]  ;;  %v3060_v23 = vpack.c.bf16 %v54_v16, %v53_v15  ;;  %v37_v24 = vld [vmem:[%s3487_s2 + $0x30] sm:$0xff]  ;;  %vm1083_vm14 = vcmask 256000  }
   0xc   :  { %2357 = vmatmul.mubr.msk.f32.vlgmr.msra.gmra.mrb[2].mxu1 %vm107_vm1, %v2894_v12  ;;  %v102_v52 = vsel %vm101_vm7, %v2889_v11, %v96_v46  ;;  %v38_v26 = vld [vmem:[%s3487_s2 + $0x38] sm:$0xff]  ;;  %v3068_v27 = vpack.c.bf16 %v64_v20, %v63_v19  ;;  %v55_v29 = vld [vmem:[%s3487_s2 + $0xc0] sm:$0xff]  ;;  %v56_v30 = vld [vmem:[%s3487_s2 + $0xc8] sm:$0xff] }
   0xd   :  { %415 = vmatprep.mubr.f32.mxu1 %v2842_v4  ;;  %2519 = vmatpush1.bf16.msra.mxu1 %v2927_v21  ;;  %v2986_v56 = vsel %vm103_vm8, %v102_v52, %v2980_v49  ;;  %v59_v42 = vld [vmem:[%s3487_s2 + $0xe0] sm:$0xff]  ;;  %v60_v43 = vld [vmem:[%s3487_s2 + $0xe8] sm:$0xff]  ;;  %v65_v52 = vld [vmem:[%s3487_s2 + $0x110] sm:$0xff] }
   0xe   :  { %2521 = vmatprep.subr.bf16.mxu1 %v2929_v22  ;;  %v3118_v46 = vpack.c.bf16 %v60_v43, %v59_v42  ;;  %v62_v57 = vld [vmem:[%s3487_s2 + $0xf8] sm:$0xff]  ;;  %v45_v59 = vld [vmem:[%s3487_s2 + $0x70] sm:$0xff] }
   0xf   :  { %v46_v61 = vld [vmem:[%s3487_s2 + $0x78] sm:$0xff] }
  0x10   :  { %v3154_v62 = vpack.c.bf16 %v46_v61, %v45_v59 }
  0x11   :  { %2523 = vmatpush1.bf16.msra.mxu1 %v2939_v25 }
  0x12   :  { %2525 = vmatprep.subr.bf16.mxu1 %v2949_v28 }
  0x15   :  { %2527 = vmatpush1.bf16.msra.mxu1 %v2957_v31 }
  0x16   :  { %2560 = vmatprep.subr.bf16.mxu1 %v2840_v1 }
  0xdb   :  { %v177_v32 = vpop.f32.mrb[0].mxu1 }
  0xdc   :  { %v2351_v33 = vpop.f32.mrb[1].mxu1 }
  0xdd   :  { %v321_v34 = vpop.f32.mrb[0].mxu0  ;;  %v3082_v33 = vpack.c.bf16 %v56_v30, %v55_v29 }
  0xde   :  { %v2365_v35 = vpop.f32.mrb[1].mxu0 }
  0xdf   :  { %v249_v36 = vpop.f32.mrb[2].mxu1  ;;  %v40_v35 = vld [vmem:[%s3487_s2 + $0x48] sm:$0xff] }
  0xe0   :  { %326 = vrot.lane.b32.xlu0 %v249_v36, %s2843_s17  ;;  %v2358_v37 = vpop.f32.mrb[3].mxu1  ;;  %v57_v36 = vld [vmem:[%s3487_s2 + $0xd0] sm:$0xff] }
  0xe1   :  { %v58_v37 = vld [vmem:[%s3487_s2 + $0xd8] sm:$0xff] }
  0xe4   :  { %330 = vrot.lane.b32.xlu0 %v321_v34, %s2844_s18  ;;  %v39_v34 = vld [vmem:[%s3487_s2 + $0x40] sm:$0xff] }
 0x152   :  { %v327_v38 = vpop.permute.xlu0 %326 }
 0x153   :  { %v333_v39 = vsel %vm107_vm1, %v177_v32, %v327_v38  ;;  %v3078_v32 = vpack.c.bf16 %v38_v26, %v37_v24  ;;  %v3097_v38 = vpack.c.bf16 %v40_v35, %v39_v34 }
 0x156   :  { %v331_v40 = vpop.permute.xlu0 %330 }
 0x157   :  { %v335_v41 = vsel %vm334_vm5, %v333_v39, %v331_v40  ;;  %v3100_v39 = vpack.c.bf16 %v58_v37, %v57_v36  ;;  %v41_v40 = vld [vmem:[%s3487_s2 + $0x50] sm:$0xff] }
 0x158   :  { %2035 = vmatmul.mubr.msk.f32.vlgmr.msra.gmra.mrb[4].mxu1 %vm347_vm6, %v335_v41  ;;  %v42_v41 = vld [vmem:[%s3487_s2 + $0x58] sm:$0xff] }
 0x159   :  { %2374 = vmatprep.mubr.msk.f32.mxu1 %vm2841_vm0, %v2842_v4  ;;  %2562 = vmatpush3.bf16.msra.mxu1 %v3068_v27  ;;  %v3115_v44 = vpack.c.bf16 %v42_v41, %v41_v40 }
 0x15a   :  { %2563 = vmatprep.subr.bf16.mxu1 %v2840_v1 }
 0x22b   :  { %v417_v48 = vpop.f32.mrb[4].mxu1 }
 0x22c   :  { %v418_v50 = vadd.f32 %v417_v48, %v2974_v45  ;;  %v419_v51 = vpop.f32.mrb[5].mxu1  ;;  %v43_v48 = vld [vmem:[%s3487_s2 + $0x60] sm:$0xff] }
 0x22d   :  { %v420_v53 = vadd.f32 %v419_v51, %v2977_v47 }
 0x22e   :  { %v422_v55 = vmax.f32 %v418_v50, 0.0  ;;  %v44_v50 = vld [vmem:[%s3487_s2 + $0x68] sm:$0xff] }
 0x22f   :  { %v423_v54 = vmax.f32 %v420_v53, 0.0  ;;  %v3127_v51 = vpack.c.bf16 %v44_v50, %v43_v48  ;;  %v66_v53 = vld [vmem:[%s3487_s2 + $0x118] sm:$0xff] }
 0x231   :  { %2036 = vmatprep.subr.msk.mxu0 %vm430_vm9, %v423_v54  ;;  %v3137_v54 = vpack.c.bf16 %v66_v53, %v65_v52 }
 0x232   :  { %2037 = vmatpush1.msk.msra.mxu0 %vm430_vm9, %v422_v55  ;;  %v61_v55 = vld [vmem:[%s3487_s2 + $0xf0] sm:$0xff] }
 0x233   :  { %2038 = vmatmul.mubr.msk.f32.vlgmr.msra.gmra.mrb[2].mxu0 %vm424_vm10, %v2986_v56  ;;  %2529 = vmatprep.subr.bf16.mxu0 %v3004_v60  ;;  %v3145_v58 = vpack.c.bf16 %v62_v57, %v61_v55 }
 0x234   :  { %507 = vmatprep.mubr.f32.mxu0 %v2842_v4  ;;  %2531 = vmatpush3.bf16.msra.mxu0 %v3015_v0 }
 0x235   :  { %2533 = vmatprep.subr.bf16.mxu0 %v3017_v2  ;;  %2565 = vmatpush3.bf16.msra.mxu1 %v3137_v54 }
 0x236   :  { %2567 = vmatprep.subr.bf16.mxu1 %v3004_v60 }
 0x237   :  { %2039 = vmatmul.mubr.msk.f32.gmra.mrb[4].mxu0 %vm424_vm10, %v2980_v49 }
 0x238   :  { %2535 = vmatpush3.bf16.msra.mxu0 %v3033_v8 }
 0x239   :  { %2537 = vmatprep.subr.bf16.mxu0 %v3036_v9 }
 0x23c   :  { %2539 = vmatpush3.bf16.msra.mxu0 %v3051_v18 }
 0x23d   :  { %2541 = vmatprep.subr.bf16.mxu0 %v3060_v23 }
 0x240   :  { %2543 = vmatpush3.bf16.msra.mxu0 %v3078_v32 }
 0x241   :  { %2545 = vmatprep.subr.bf16.mxu0 %v3082_v33 }
 0x244   :  { %2547 = vmatpush3.bf16.msra.mxu0 %v3097_v38 }
 0x245   :  { %2549 = vmatprep.subr.bf16.mxu0 %v3100_v39 }
 0x248   :  { %2551 = vmatpush3.bf16.msra.mxu0 %v3115_v44 }
 0x249   :  { %2553 = vmatprep.subr.bf16.mxu0 %v3118_v46 }
 0x24c   :  { %2555 = vmatpush3.bf16.msra.mxu0 %v3127_v51 }
 0x24d   :  { %2557 = vmatprep.subr.bf16.mxu0 %v3145_v58 }
 0x250   :  { %2559 = vmatpush3.bf16.msra.mxu0 %v3154_v62 }
 0x251   :  { %2598 = vmatprep.subr.bf16.mxu0 %v2840_v1 }
 0x306   :  { %v503_v63 = vpop.f32.mrb[2].mxu0 }
 0x307   :  { %v3160_v3 = vpop.f32.mrb[3].mxu0  ;;  %v515_v5 = vrot.slane %v503_v63, 3  ;;  %v521_v15 = vrot.slane %v503_v63, 6 }
 0x308   :  { %v685_v6 = vrot.slane %v3160_v3, 3  ;;  %v2825_v7 = vpack.i.bf16 %v3160_v3, %v503_v63  ;;  %v694_v20 = vrot.slane %v3160_v3, 6 }
 0x309   :  { %516 = vrot.lane.b32.xlu1 %v515_v5, %s2845_s16 }
 0x30a   :  { %v2820_v10 = vpack.i.bf16 %v685_v6, %v515_v5  ;;  %v509_v14 = vpop.f32.mrb[4].mxu0  ;;  %v2046_v5 = vld [vmem:[%s3485_s0 + $0x10] sm:$0xff] }
 0x30b   :  { %v522_v16 = vrot.slane %v509_v14, 6  ;;  %v511_v19 = vpop.f32.mrb[5].mxu0 }
 0x30c   :  { %v695_v24 = vrot.slane %v511_v19, 6  ;;  %2821 = vrot.lane.b32.xlu0 %v2820_v10, %s2844_s18  ;;  %v69_v10 = vld [vmem:[%s3488_s3 + $0x8] sm:$0xff] }
 0x30d   :  { %v523_v26 = vsel %vm520_vm11, %v521_v15, %v522_v16  ;;  %v73_v15 = vld [vmem:[%s3488_s3 + $0x28] sm:$0xff] }
 0x30e   :  { %524 = vrot.lane.b32.xlu1 %v523_v26, %s2846_s19  ;;  %v696_v29 = vsel %vm520_vm11, %v694_v20, %v695_v24 }
 0x310   :  { %843 = vrot.lane.b32.xlu0 %v685_v6, %s2845_s16  ;;  %v2047_v6 = vld [vmem:[%s3485_s0 + $0x18] sm:$0xff] }
 0x312   :  { %2826 = vrot.lane.b32.xlu1 %v2825_v7, %s2846_s19  ;;  %v3239_v7 = vpack.c.bf16 %v2047_v6, %v2046_v5 }
 0x316   :  { %846 = vrot.lane.b32.xlu1 %v696_v29, %s2846_s19 }
 0x37b   :  { %v517_v30 = vpop.permute.xlu1 %516 }
 0x37c   :  { %v528_v42 = vsel %vm527_vm13, %v503_v63, %v517_v30 }
 0x37e   :  { %v2822_v34 = vpop.permute.xlu0 %2821 }
 0x37f   :  { %v2824_v35 = vunpack.i.h.bf16 %v2822_v34  ;;  %v2823_v36 = vunpack.i.l.bf16 %v2822_v34  ;;  %v74_v34 = vld [vmem:[%s3488_s3 + $0x30] sm:$0xff] }
 0x380   :  { %v525_v37 = vpop.permute.xlu1 %524 }
 0x381   :  { %2375 = vmatmul.mubr.msk.f32.vlgmr.msra.gmra.mrb[6].mxu1 %vm334_vm5, %v525_v37  ;;  %v530_v40 = vsel %vm529_vm12, %v517_v30, %v525_v37  ;;  %v690_v41 = vsel %vm334_vm5, %v2823_v36, %v2824_v35  ;;  %v75_v35 = vld [vmem:[%s3488_s3 + $0x38] sm:$0xff]  ;;  %v76_v37 = vld [vmem:[%s3488_s3 + $0x40] sm:$0xff] }
 0x382   :  { %2569 = vmatpush3.bf16.msra.mxu1 %v3015_v0  ;;  %601 = vmatprep.mubr.f32.mxu0 %v530_v40  ;;  %v699_v43 = vsel %vm529_vm12, %v690_v41, %v523_v26  ;;  %v844_v50 = vpop.permute.xlu0 %843  ;;  %v77_v40 = vld [vmem:[%s3488_s3 + $0x48] sm:$0xff] }
 0x383   :  { %602 = vmatmul.mubr.f32.vlgmr.msra.gmra.mrb[6].mxu0 %v528_v42  ;;  %766 = vmatprep.mubr.f32.mxu1 %v699_v43  ;;  %v849_v63 = vsel %vm527_vm13, %v3160_v3, %v844_v50  ;;  %v68_v3 = vld [vmem:[%s3488_s3] sm:$0xff]  ;;  %v3310_v41 = vpack.c.bf16 %v77_v40, %v76_v37  ;;  %v78_v42 = vld [vmem:[%s3488_s3 + $0x50] sm:$0xff]  ;;  %v79_v43 = vld [vmem:[%s3488_s3 + $0x58] sm:$0xff] }
 0x384   :  { %2600 = vmatpush3.bf16.msra.mxu0 %v3068_v27  ;;  %2571 = vmatprep.subr.bf16.mxu1 %v3017_v2  ;;  %v2827_v48 = vpop.permute.xlu1 %2826 }
 0x385   :  { %2601 = vmatprep.subr.bf16.mxu0 %v2840_v1  ;;  %2385 = vmatprep.mubr.msk.f32.mxu0 %vm2841_vm0, %v2842_v4  ;;  %v2829_v55 = vunpack.i.h.bf16 %v2827_v48  ;;  %v2828_v57 = vunpack.i.l.bf16 %v2827_v48 }
 0x386   :  { %2573 = vmatpush3.bf16.msra.mxu1 %v3033_v8 }
 0x387   :  { %2575 = vmatprep.subr.bf16.mxu1 %v3036_v9  ;;  %v683_v59 = vsel %vm529_vm12, %v2828_v57, %v2829_v55 }
 0x388   :  { %2603 = vmatpush3.bf16.msra.mxu0 %v3137_v54  ;;  %v847_v52 = vpop.permute.xlu1 %846  ;;  %v698_v61 = vsel %vm527_vm13, %v683_v59, %v2823_v36  ;;  %v3300_v36 = vpack.c.bf16 %v75_v35, %v74_v34 }
 0x389   :  { %2605 = vmatprep.subr.bf16.mxu0 %v3004_v60  ;;  %v850_v53 = vsel %vm529_vm12, %v844_v50, %v847_v52 }
 0x38a   :  { %2577 = vmatpush3.bf16.msra.mxu1 %v3051_v18 }
 0x38b   :  { %2386 = vmatmul.mubr.msk.f32.vlgmr.msra.gmra.mrb[8].mxu0 %vm334_vm5, %v696_v29  ;;  %2579 = vmatprep.subr.bf16.mxu1 %v3060_v23 }
 0x38c   :  { %2607 = vmatpush3.bf16.msra.mxu0 %v3015_v0  ;;  %917 = vmatprep.mubr.f32.mxu0 %v850_v53 }
 0x38d   :  { %2609 = vmatprep.subr.bf16.mxu0 %v3017_v2 }
 0x38e   :  { %2581 = vmatpush3.bf16.msra.mxu1 %v3078_v32 }
 0x38f   :  { %2583 = vmatprep.subr.bf16.mxu1 %v3082_v33 }
 0x390   :  { %2611 = vmatpush3.bf16.msra.mxu0 %v3033_v8 }
 0x391   :  { %2613 = vmatprep.subr.bf16.mxu0 %v3036_v9 }
 0x392   :  { %2585 = vmatpush3.bf16.msra.mxu1 %v3097_v38 }
 0x393   :  { %2587 = vmatprep.subr.bf16.mxu1 %v3100_v39 }
 0x394   :  { %2615 = vmatpush3.bf16.msra.mxu0 %v3051_v18 }
 0x395   :  { %2617 = vmatprep.subr.bf16.mxu0 %v3060_v23 }
 0x396   :  { %2589 = vmatpush3.bf16.msra.mxu1 %v3115_v44 }
 0x397   :  { %2591 = vmatprep.subr.bf16.mxu1 %v3118_v46 }
 0x398   :  { %2619 = vmatpush3.bf16.msra.mxu0 %v3078_v32 }
 0x399   :  { %2621 = vmatprep.subr.bf16.mxu0 %v3082_v33 }
 0x39a   :  { %2593 = vmatpush3.bf16.msra.mxu1 %v3127_v51 }
 0x39b   :  { %2595 = vmatprep.subr.bf16.mxu1 %v3145_v58 }
 0x39c   :  { %2623 = vmatpush3.bf16.msra.mxu0 %v3097_v38 }
 0x39d   :  { %2625 = vmatprep.subr.bf16.mxu0 %v3100_v39 }
 0x39e   :  { %2597 = vmatpush3.bf16.msra.mxu1 %v3154_v62 }
 0x39f   :  { %2636 = vmatprep.subr.bf16.mxu1 %v2840_v1 }
 0x3a0   :  { %2627 = vmatpush3.bf16.msra.mxu0 %v3115_v44 }
 0x3a1   :  { %767 = vmatmul.mubr.f32.vlgmr.msra.gmra.mrb[8].mxu1 %v698_v61  ;;  %2629 = vmatprep.subr.bf16.mxu0 %v3118_v46 }
 0x3a2   :  { %2638 = vmatpush3.bf16.msra.mxu1 %v3068_v27  ;;  %2396 = vmatprep.mubr.msk.f32.mxu1 %vm2841_vm0, %v2842_v4 }
 0x3a3   :  { %2639 = vmatprep.subr.bf16.mxu1 %v2840_v1 }
 0x3a4   :  { %2631 = vmatpush3.bf16.msra.mxu0 %v3127_v51 }
 0x3a5   :  { %2633 = vmatprep.subr.bf16.mxu0 %v3145_v58 }
 0x3a6   :  { %2641 = vmatpush3.bf16.msra.mxu1 %v3137_v54 }
 0x3a7   :  { %2642 = vmatprep.subr.bf16.mxu1 %v2840_v1 }
 0x3a8   :  { %2635 = vmatpush3.bf16.msra.mxu0 %v3154_v62 }
 0x3a9   :  { %2397 = vmatmul.mubr.msk.f32.vlgmr.msra.gmra.mrb[10].mxu1 %vm334_vm5, %v847_v52  ;;  %2660 = vmatprep.subr.bf16.mxu0 %v2840_v1  ;;  %v3319_v52 = vpack.c.bf16 %v79_v43, %v78_v42 }
 0x3aa   :  { %2423 = vmatprep.mubr.msk.f32.mxu1 %vm2841_vm0, %v2842_v4 }
 0x3ab   :  { %918 = vmatmul.mubr.f32.vlgmr.msra.gmra.mrb[10].mxu0 %v849_v63 }
 0x3ac   :  { %2430 = vmatprep.mubr.msk.f32.mxu0 %vm2841_vm0, %v2842_v4  ;;  %2662 = vmatpush3.bf16.msra.mxu0 %v3239_v7 }
 0x3ad   :  { %2663 = vmatprep.subr.bf16.mxu0 %v2840_v1 }
 0x3af   :  { %2431 = vmatmul.mubr.msk.f32.vlgmr.msra.gmra.mrb[12].mxu0 %vm107_vm1, %v2889_v11  ;;  %v70_v11 = vld [vmem:[%s3488_s3 + $0x10] sm:$0xff] }
 0x3b0   :  { %2665 = vmatpush3.bf16.msra.mxu0 %v3239_v7  ;;  %2437 = vmatprep.mubr.msk.f32.mxu0 %vm2841_vm0, %v2842_v4 }
 0x3b1   :  { %2670 = vmatprep.subr.bf16.mxu0 %v2916_v17  ;;  %v3262_v17 = vpack.c.bf16 %v69_v10, %v68_v3 }
 0x3b3   :  { %2438 = vmatmul.mubr.msk.f32.vlgmr.msra.gmra.mrb[14].mxu0 %vm107_vm1, %v2894_v12  ;;  %v71_v12 = vld [vmem:[%s3488_s3 + $0x18] sm:$0xff]  ;;  %2644 = vmatpush3.bf16.msra.mxu1 %v3262_v17 }
 0x3b4   :  { %2672 = vmatpush1.bf16.msra.mxu0 %v2927_v21  ;;  %1375 = vmatprep.mubr.f32.mxu0 %v2842_v4  ;;  %v3269_v14 = vpack.c.bf16 %v71_v12, %v70_v11  ;;  %v72_v21 = vld [vmem:[%s3488_s3 + $0x20] sm:$0xff] }
 0x3b5   :  { %2674 = vmatprep.subr.bf16.mxu0 %v2929_v22  ;;  %2645 = vmatprep.subr.bf16.mxu1 %v2840_v1  ;;  %v3281_v22 = vpack.c.bf16 %v73_v15, %v72_v21 }
 0x3b7   :  { %2647 = vmatpush3.bf16.msra.mxu1 %v3269_v14 }
 0x3b8   :  { %2676 = vmatpush1.bf16.msra.mxu0 %v2939_v25  ;;  %2648 = vmatprep.subr.bf16.mxu1 %v2840_v1  ;;  %v3291_v25 = vld [vmem:[%s3487_s2 + $0x120] ss:$0 sm:$0xff] }
 0x3b9   :  { %2678 = vmatprep.subr.bf16.mxu0 %v2949_v28 }
 0x3bb   :  { %2650 = vmatpush3.bf16.msra.mxu1 %v3281_v22 }
 0x3bc   :  { %2680 = vmatpush1.bf16.msra.mxu0 %v2957_v31  ;;  %2651 = vmatprep.subr.bf16.mxu1 %v2840_v1 }
 0x3bd   :  { %2713 = vmatprep.subr.bf16.mxu0 %v2840_v1 }
 0x3bf   :  { %2653 = vmatpush3.bf16.msra.mxu1 %v3300_v36 }
 0x3c0   :  { %2654 = vmatprep.subr.bf16.mxu1 %v2840_v1 }
 0x3c3   :  { %2656 = vmatpush3.bf16.msra.mxu1 %v3310_v41 }
 0x3c4   :  { %2657 = vmatprep.subr.bf16.mxu1 %v2840_v1 }
 0x3c7   :  { %2659 = vmatpush3.bf16.msra.mxu1 %v3319_v52 }
 0x3c8   :  { %2666 = vmatprep.subr.bf16.mxu1 %v2840_v1 }
 0x454   :  { %v673_v16 = vpop.f32.mrb[6].mxu1 }
 0x455   :  { %v2376_v19 = vpop.f32.mrb[7].mxu1 }
 0x456   :  { %v2102_v20 = vpop.f32.mrb[6].mxu0 }
 0x457   :  { %v2103_v28 = vpop.f32.mrb[7].mxu0 }
 0x458   :  { %v2104_v24 = vadd.f32 %v2103_v28, %v2102_v20 }
 0x45a   :  { %v604_v26 = vadd.f32 %v2104_v24, %v3291_v25 }
 0x45c   :  { %v674_v29 = vadd.f32 %v673_v16, %v604_v26 }
 0x45e   :  { %v838_v31 = vpop.f32.mrb[8].mxu0  ;;  %v677_v28 = vmax.f32 %v674_v29, 0.0  ;;  %v3341_v29 = vld [vmem:[%s3488_s3 + $0x60] ss:$0 sm:$0xff] }
 0x45f   :  { %v2387_v30 = vpop.f32.mrb[9].mxu0 }
 0x474   :  { %v2142_v48 = vpop.f32.mrb[8].mxu1 }
 0x475   :  { %v2143_v50 = vpop.f32.mrb[9].mxu1 }
 0x476   :  { %v2144_v53 = vadd.f32 %v2143_v50, %v2142_v48 }
 0x478   :  { %v769_v55 = vadd.f32 %v2144_v53, %v3291_v25 }
 0x47a   :  { %v839_v57 = vadd.f32 %v838_v31, %v769_v55 }
 0x47c   :  { %v989_v59 = vpop.f32.mrb[10].mxu1  ;;  %v842_v61 = vmax.f32 %v839_v57, 0.0 }
 0x47d   :  { %v2398_v63 = vpop.f32.mrb[11].mxu1 }
 0x47e   :  { %995 = vrot.lane.b32.xlu0 %v842_v61, %s2844_s18  ;;  %v2182_v5 = vpop.f32.mrb[10].mxu0 }
 0x47f   :  { %v2183_v6 = vpop.f32.mrb[11].mxu0 }
 0x480   :  { %v2184_v3 = vadd.f32 %v2183_v6, %v2182_v5 }
 0x482   :  { %v920_v10 = vadd.f32 %v2184_v3, %v3291_v25  ;;  %v1154_v21 = vpop.f32.mrb[12].mxu0 }
 0x483   :  { %v2432_v15 = vpop.f32.mrb[13].mxu0 }
 0x484   :  { %v990_v11 = vadd.f32 %v989_v59, %v920_v10 }
 0x486   :  { %v993_v12 = vmax.f32 %v990_v11, 0.0  ;;  %v1224_v16 = vpop.f32.mrb[14].mxu0 }
 0x487   :  { %1299 = vrot.lane.b32.xlu0 %v1224_v16, %s2843_s17  ;;  %v2439_v19 = vpop.f32.mrb[15].mxu0 }
 0x488   :  { %999 = vrot.lane.b32.xlu1 %v993_v12, %s2846_s19 }
 0x4f0   :  { %v996_v20 = vpop.permute.xlu0 %995 }
 0x4f1   :  { %v1002_v24 = vsel %vm334_vm5, %v677_v28, %v996_v20 }
 0x4f9   :  { %v1300_v43 = vpop.permute.xlu0 %1299 }
 0x4fa   :  { %v1000_v26 = vpop.permute.xlu1 %999  ;;  %v1306_v48 = vsel %vm107_vm1, %v1154_v21, %v1300_v43 }
 0x4fb   :  { %v1003_v31 = vsel %vm529_vm12, %v1002_v24, %v1000_v26 }
 0x4fc   :  { %2424 = vmatmul.mubr.msk.f32.vlgmr.msra.gmra.mrb[12].mxu1 %vm527_vm13, %v1003_v31 }
 0x4fd   :  { %2668 = vmatpush3.bf16.msra.mxu1 %v3239_v7  ;;  %2444 = vmatprep.mubr.msk.f32.mxu1 %vm2841_vm0, %v2842_v4  ;;  %v3347_v7 = vld [vmem:[%s3488_s3 + $0x61] sm:$0x7] }
 0x500   :  { %2445 = vmatmul.mubr.msk.f32.vlgmr.msra.gmra.mrb[14].mxu1 %vm107_vm1, %v2899_v13 }
 0x501   :  { %1454 = vmatprep.mubr.f32.mxu1 %v2842_v4 }
 0x5cf   :  { %v1077_v30 = vpop.f32.mrb[12].mxu1 }
 0x5d0   :  { %v1078_v34 = vadd.f32 %v3341_v29, %v1077_v30  ;;  %v2425_v35 = vpop.f32.mrb[13].mxu1 }
 0x5d2   :  { %v1081_v37 = vmul.f32 5.656854, %v1078_v34 }
 0x5d3   :  { %v1294_v40 = vpop.f32.mrb[14].mxu1 }
 0x5d4   :  { %v1082_v13 = vadd.f32 %v1081_v37, %v3347_v7  ;;  %1303 = vrot.lane.b32.xlu1 %v1294_v40, %s2844_s18  ;;  %v2446_v42 = vpop.f32.mrb[15].mxu1 }
 0x5d6   :  { %1084 = vst.msk [vmem:[%s3489_s4] sm:$0x7] %vm1083_vm14, %v1082_v13 }
 0x646   :  { %v1304_v50 = vpop.permute.xlu1 %1303 }
 0x647   :  { %v1307_v53 = vsel %vm334_vm5, %v1306_v48, %v1304_v50 }
 0x648   :  { %2051 = vmatmul.mubr.msk.f32.vlgmr.msra.gmra.mrb[16].mxu0 %vm347_vm6, %v1307_v53 }
 0x649   :  { %2715 = vmatpush3.bf16.msra.mxu0 %v3068_v27  ;;  %2455 = vmatprep.mubr.msk.f32.mxu0 %vm2841_vm0, %v2842_v4 }
 0x64a   :  { %2716 = vmatprep.subr.bf16.mxu0 %v2840_v1 }
 0x64d   :  { %2718 = vmatpush3.bf16.msra.mxu0 %v3137_v54 }
 0x64e   :  { %2720 = vmatprep.subr.bf16.mxu0 %v3004_v60 }
 0x71b   :  { %v1377_v55 = vpop.f32.mrb[16].mxu0 }
 0x71c   :  { %v1378_v57 = vadd.f32 %v1377_v55, %v2974_v45  ;;  %v1379_v59 = vpop.f32.mrb[17].mxu0 }
 0x71d   :  { %v1380_v61 = vadd.f32 %v1379_v59, %v2977_v47 }
 0x71e   :  { %v1382_v5 = vmax.f32 %v1378_v57, 0.0 }
 0x71f   :  { %v1383_v63 = vmax.f32 %v1380_v61, 0.0 }
 0x721   :  { %2052 = vmatprep.subr.msk.mxu1 %vm430_vm9, %v1383_v63 }
 0x722   :  { %2053 = vmatpush1.msk.msra.mxu1 %vm430_vm9, %v1382_v5 }
 0x723   :  { %2054 = vmatmul.mubr.msk.f32.vlgmr.msra.gmra.mrb[16].mxu1 %vm424_vm10, %v2986_v56  ;;  %2682 = vmatprep.subr.bf16.mxu1 %v3004_v60 }
 0x724   :  { %1460 = vmatprep.mubr.f32.mxu1 %v2842_v4  ;;  %2684 = vmatpush3.bf16.msra.mxu1 %v3015_v0 }
 0x725   :  { %2686 = vmatprep.subr.bf16.mxu1 %v3017_v2 }
 0x727   :  { %2055 = vmatmul.mubr.msk.f32.gmra.mrb[18].mxu1 %vm424_vm10, %v2980_v49 }
 0x728   :  { %2688 = vmatpush3.bf16.msra.mxu1 %v3033_v8 }
 0x729   :  { %2690 = vmatprep.subr.bf16.mxu1 %v3036_v9 }
 0x72c   :  { %2692 = vmatpush3.bf16.msra.mxu1 %v3051_v18 }
 0x72d   :  { %2694 = vmatprep.subr.bf16.mxu1 %v3060_v23 }
 0x730   :  { %2696 = vmatpush3.bf16.msra.mxu1 %v3078_v32 }
 0x731   :  { %2698 = vmatprep.subr.bf16.mxu1 %v3082_v33 }
 0x734   :  { %2700 = vmatpush3.bf16.msra.mxu1 %v3097_v38 }
 0x735   :  { %2702 = vmatprep.subr.bf16.mxu1 %v3100_v39 }
 0x738   :  { %2704 = vmatpush3.bf16.msra.mxu1 %v3115_v44 }
 0x739   :  { %2706 = vmatprep.subr.bf16.mxu1 %v3118_v46 }
 0x73c   :  { %2708 = vmatpush3.bf16.msra.mxu1 %v3127_v51 }
 0x73d   :  { %2710 = vmatprep.subr.bf16.mxu1 %v3145_v58 }
 0x740   :  { %2712 = vmatpush3.bf16.msra.mxu1 %v3154_v62 }
 0x741   :  { %2751 = vmatprep.subr.bf16.mxu1 %v2840_v1 }
 0x7f6   :  { %v1456_v45 = vpop.f32.mrb[16].mxu1 }
 0x7f7   :  { %v3390_v47 = vpop.f32.mrb[17].mxu1  ;;  %v1468_v49 = vrot.slane %v1456_v45, 3  ;;  %v1473_v11 = vrot.slane %v1456_v45, 6 }
 0x7f8   :  { %v1631_v56 = vrot.slane %v3390_v47, 3  ;;  %v2835_v6 = vpack.i.bf16 %v3390_v47, %v1456_v45  ;;  %v1640_v15 = vrot.slane %v3390_v47, 6 }
 0x7f9   :  { %1469 = vrot.lane.b32.xlu0 %v1468_v49, %s2845_s16 }
 0x7fa   :  { %v1462_v3 = vpop.f32.mrb[18].mxu1  ;;  %v2830_v10 = vpack.i.bf16 %v1631_v56, %v1468_v49 }
 0x7fb   :  { %v1474_v12 = vrot.slane %v1462_v3, 6  ;;  %v1464_v21 = vpop.f32.mrb[19].mxu1 }
 0x7fc   :  { %v1641_v16 = vrot.slane %v1464_v21, 6 }
 0x7fd   :  { %2831 = vrot.lane.b32.xlu0 %v2830_v10, %s2844_s18  ;;  %v1475_v19 = vsel %vm520_vm11, %v1473_v11, %v1474_v12 }
 0x7fe   :  { %1476 = vrot.lane.b32.xlu1 %v1475_v19, %s2846_s19  ;;  %v1642_v20 = vsel %vm520_vm11, %v1640_v15, %v1641_v16 }
 0x801   :  { %1789 = vrot.lane.b32.xlu0 %v1631_v56, %s2845_s16 }
 0x802   :  { %2836 = vrot.lane.b32.xlu1 %v2835_v6, %s2846_s19 }
 0x806   :  { %1792 = vrot.lane.b32.xlu1 %v1642_v20, %s2846_s19 }
 0x86b   :  { %v1470_v28 = vpop.permute.xlu0 %1469 }
 0x86c   :  { %v1479_v35 = vsel %vm527_vm13, %v1456_v45, %v1470_v28 }
 0x86f   :  { %v2832_v24 = vpop.permute.xlu0 %2831 }
 0x870   :  { %v2834_v26 = vunpack.i.h.bf16 %v2832_v24  ;;  %v2833_v31 = vunpack.i.l.bf16 %v2832_v24  ;;  %v1477_v30 = vpop.permute.xlu1 %1476 }
 0x871   :  { %2456 = vmatmul.mubr.msk.f32.vlgmr.msra.gmra.mrb[18].mxu0 %vm334_vm5, %v1477_v30  ;;  %v1480_v34 = vsel %vm529_vm12, %v1470_v28, %v1477_v30 }
 0x872   :  { %2722 = vmatpush3.bf16.msra.mxu0 %v3015_v0  ;;  %1547 = vmatprep.mubr.f32.mxu1 %v1480_v34  ;;  %v1636_v37 = vsel %vm334_vm5, %v2833_v31, %v2834_v26 }
 0x873   :  { %1548 = vmatmul.mubr.f32.vlgmr.msra.gmra.mrb[20].mxu1 %v1479_v35  ;;  %2724 = vmatprep.subr.bf16.mxu0 %v3017_v2  ;;  %v1645_v40 = vsel %vm529_vm12, %v1636_v37, %v1475_v19  ;;  %v1790_v42 = vpop.permute.xlu0 %1789 }
 0x874   :  { %2753 = vmatpush3.bf16.msra.mxu1 %v3068_v27  ;;  %v2837_v13 = vpop.permute.xlu1 %2836  ;;  %1712 = vmatprep.mubr.f32.mxu0 %v1645_v40 }
 0x875   :  { %2754 = vmatprep.subr.bf16.mxu1 %v2840_v1  ;;  %2466 = vmatprep.mubr.msk.f32.mxu1 %vm2841_vm0, %v2842_v4 }
 0x876   :  { %2726 = vmatpush3.bf16.msra.mxu0 %v3033_v8 }
 0x877   :  { %2728 = vmatprep.subr.bf16.mxu0 %v3036_v9 }
 0x878   :  { %2756 = vmatpush3.bf16.msra.mxu1 %v3137_v54  ;;  %v1793_v43 = vpop.permute.xlu1 %1792 }
 0x879   :  { %2758 = vmatprep.subr.bf16.mxu1 %v3004_v60  ;;  %v1796_v48 = vsel %vm529_vm12, %v1790_v42, %v1793_v43  ;;  %v2839_v60 = vunpack.i.h.bf16 %v2837_v13 }
 0x87a   :  { %2730 = vmatpush3.bf16.msra.mxu0 %v3051_v18 }
 0x87b   :  { %2467 = vmatmul.mubr.msk.f32.vlgmr.msra.gmra.mrb[22].mxu1 %vm334_vm5, %v1642_v20  ;;  %2732 = vmatprep.subr.bf16.mxu0 %v3060_v23 }
 0x87c   :  { %2760 = vmatpush3.bf16.msra.mxu1 %v3015_v0  ;;  %1863 = vmatprep.mubr.f32.mxu1 %v1796_v48  ;;  %v2838_v0 = vunpack.i.l.bf16 %v2837_v13 }
 0x87d   :  { %2762 = vmatprep.subr.bf16.mxu1 %v3017_v2 }
 0x87e   :  { %2734 = vmatpush3.bf16.msra.mxu0 %v3078_v32  ;;  %v1629_v2 = vsel %vm529_vm12, %v2838_v0, %v2839_v60 }
 0x87f   :  { %2736 = vmatprep.subr.bf16.mxu0 %v3082_v33 }
 0x880   :  { %2764 = vmatpush3.bf16.msra.mxu1 %v3033_v8  ;;  %v1644_v8 = vsel %vm527_vm13, %v1629_v2, %v2833_v31 }
 0x881   :  { %2766 = vmatprep.subr.bf16.mxu1 %v3036_v9  ;;  %v1795_v9 = vsel %vm527_vm13, %v3390_v47, %v1790_v42 }
 0x882   :  { %2738 = vmatpush3.bf16.msra.mxu0 %v3097_v38 }
 0x883   :  { %2740 = vmatprep.subr.bf16.mxu0 %v3100_v39 }
 0x884   :  { %2768 = vmatpush3.bf16.msra.mxu1 %v3051_v18 }
 0x885   :  { %2770 = vmatprep.subr.bf16.mxu1 %v3060_v23 }
 0x886   :  { %2742 = vmatpush3.bf16.msra.mxu0 %v3115_v44 }
 0x887   :  { %2744 = vmatprep.subr.bf16.mxu0 %v3118_v46 }
 0x888   :  { %2772 = vmatpush3.bf16.msra.mxu1 %v3078_v32 }
 0x889   :  { %2774 = vmatprep.subr.bf16.mxu1 %v3082_v33 }
 0x88a   :  { %2746 = vmatpush3.bf16.msra.mxu0 %v3127_v51 }
 0x88b   :  { %2748 = vmatprep.subr.bf16.mxu0 %v3145_v58 }
 0x88c   :  { %2776 = vmatpush3.bf16.msra.mxu1 %v3097_v38 }
 0x88d   :  { %2778 = vmatprep.subr.bf16.mxu1 %v3100_v39 }
 0x88e   :  { %2750 = vmatpush3.bf16.msra.mxu0 %v3154_v62 }
 0x88f   :  { %2789 = vmatprep.subr.bf16.mxu0 %v2840_v1 }
 0x890   :  { %2780 = vmatpush3.bf16.msra.mxu1 %v3115_v44 }
 0x891   :  { %1713 = vmatmul.mubr.f32.vlgmr.msra.gmra.mrb[20].mxu0 %v1644_v8  ;;  %2782 = vmatprep.subr.bf16.mxu1 %v3118_v46 }
 0x892   :  { %2791 = vmatpush3.bf16.msra.mxu0 %v3068_v27  ;;  %2477 = vmatprep.mubr.msk.f32.mxu0 %vm2841_vm0, %v2842_v4 }
 0x893   :  { %2792 = vmatprep.subr.bf16.mxu0 %v2840_v1 }
 0x894   :  { %2784 = vmatpush3.bf16.msra.mxu1 %v3127_v51 }
 0x895   :  { %2786 = vmatprep.subr.bf16.mxu1 %v3145_v58 }
 0x896   :  { %2794 = vmatpush3.bf16.msra.mxu0 %v3137_v54 }
 0x897   :  { %2795 = vmatprep.subr.bf16.mxu0 %v2840_v1 }
 0x898   :  { %2788 = vmatpush3.bf16.msra.mxu1 %v3154_v62 }
 0x899   :  { %2478 = vmatmul.mubr.msk.f32.vlgmr.msra.gmra.mrb[22].mxu0 %vm334_vm5, %v1793_v43 }
 0x89a   :  { %2797 = vmatpush3.bf16.msra.mxu0 %v3262_v17  ;;  %2504 = vmatprep.mubr.msk.f32.mxu0 %vm2841_vm0, %v2842_v4 }
 0x89b   :  { %1864 = vmatmul.mubr.f32.vlgmr.msra.gmra.mrb[24].mxu1 %v1795_v9  ;;  %2798 = vmatprep.subr.bf16.mxu0 %v2840_v1 }
 0x89e   :  { %2800 = vmatpush3.bf16.msra.mxu0 %v3269_v14 }
 0x89f   :  { %2801 = vmatprep.subr.bf16.mxu0 %v2840_v1 }
 0x8a2   :  { %2803 = vmatpush3.bf16.msra.mxu0 %v3281_v22 }
 0x8a3   :  { %2804 = vmatprep.subr.bf16.mxu0 %v2840_v1 }
 0x8a6   :  { %2806 = vmatpush3.bf16.msra.mxu0 %v3300_v36 }
 0x8a7   :  { %2807 = vmatprep.subr.bf16.mxu0 %v2840_v1 }
 0x8aa   :  { %2809 = vmatpush3.bf16.msra.mxu0 %v3310_v41 }
 0x8ab   :  { %2810 = vmatprep.subr.bf16.mxu0 %v2840_v1 }
 0x8ae   :  { %2812 = vmatpush3.bf16.msra.mxu0 %v3319_v52 }
 0x944   :  { %v1619_v4 = vpop.f32.mrb[18].mxu0 }
 0x945   :  { %v2457_v18 = vpop.f32.mrb[19].mxu0 }
 0x946   :  { %v2244_v23 = vpop.f32.mrb[20].mxu1 }
 0x947   :  { %v2245_v27 = vpop.f32.mrb[21].mxu1 }
 0x948   :  { %v2246_v32 = vadd.f32 %v2245_v27, %v2244_v23 }
 0x94a   :  { %v1550_v33 = vadd.f32 %v2246_v32, %v3291_v25 }
 0x94c   :  { %v1620_v38 = vadd.f32 %v1619_v4, %v1550_v33 }
 0x94e   :  { %v1784_v39 = vpop.f32.mrb[22].mxu1  ;;  %v1623_v57 = vmax.f32 %v1620_v38, 0.0 }
 0x94f   :  { %v2468_v44 = vpop.f32.mrb[23].mxu1 }
 0x964   :  { %v2284_v46 = vpop.f32.mrb[20].mxu0 }
 0x965   :  { %v2285_v51 = vpop.f32.mrb[21].mxu0 }
 0x966   :  { %v2286_v54 = vadd.f32 %v2285_v51, %v2284_v46 }
 0x968   :  { %v1715_v58 = vadd.f32 %v2286_v54, %v3291_v25 }
 0x96a   :  { %v1785_v62 = vadd.f32 %v1784_v39, %v1715_v58 }
 0x96c   :  { %v1935_v17 = vpop.f32.mrb[22].mxu0  ;;  %v1788_v1 = vmax.f32 %v1785_v62, 0.0 }
 0x96d   :  { %v2479_v14 = vpop.f32.mrb[23].mxu0 }
 0x96e   :  { %1941 = vrot.lane.b32.xlu0 %v1788_v1, %s2844_s18  ;;  %v2324_v22 = vpop.f32.mrb[24].mxu1 }
 0x96f   :  { %v2325_v36 = vpop.f32.mrb[25].mxu1 }
 0x970   :  { %v2326_v41 = vadd.f32 %v2325_v36, %v2324_v22 }
 0x972   :  { %v1866_v52 = vadd.f32 %v2326_v41, %v3291_v25 }
 0x974   :  { %v1936_v50 = vadd.f32 %v1935_v17, %v1866_v52 }
 0x976   :  { %v1939_v53 = vmax.f32 %v1936_v50, 0.0 }
 0x978   :  { %1945 = vrot.lane.b32.xlu1 %v1939_v53, %s2846_s19 }
 0x9e0   :  { %v1942_v55 = vpop.permute.xlu0 %1941 }
 0x9e1   :  { %v1948_v59 = vsel %vm334_vm5, %v1623_v57, %v1942_v55 }
 0x9ea   :  { %v1946_v61 = vpop.permute.xlu1 %1945 }
 0x9eb   :  { %v1949_v63 = vsel %vm529_vm12, %v1948_v59, %v1946_v61 }
 0x9ec   :  { %2505 = vmatmul.mubr.msk.f32.vlgmr.msra.gmra.mrb[24].mxu0 %vm527_vm13, %v1949_v63 }
 0xabf   :  { %v2019_v5 = vpop.f32.mrb[24].mxu0 }
 0xac0   :  { %v2020_v45 = vadd.f32 %v3341_v29, %v2019_v5  ;;  %v2506_v47 = vpop.f32.mrb[25].mxu0 }
 0xac2   :  { %v2023_v49 = vmul.f32 5.656854, %v2020_v45 }
 0xac4   :  { %v2024_v25 = vadd.f32 %v2023_v49, %v3347_v7 }
 0xac6   :  { %2060 = vst.msk [vmem:[%s3489_s4 + $0x4] sm:$0x7] %vm1083_vm14, %v2024_v25 }

</bundles_post_ra>
